<compile_context>
chip_gen: v7x
topology: tpu7x:2x2x1
jax: 0.10.0
libtpu: 0.0.40
codegen_flags: <defaults>
</compile_context>

<pallas_src>
import functools

import jax
import jax.numpy as jnp
from jax import lax
from jax.experimental import pallas as pl
from jax.experimental.pallas import tpu as pltpu

EPS = 1e-5
LANES = 128
_MiB = 1 << 20


def _round_up(x, m):
    return (x + m - 1) // m * m


# ---------------------------------------------------------------------------
# Pass 1: conv (single im2col matmul per row tile) + per-tile channel
#         sum / sum-of-squares partials (from the f32 accumulator, so the
#         bf16 writeback does not perturb the BN statistics).
# ---------------------------------------------------------------------------
def _conv_stats_kernel(p_ref, w_ref, o_ref, s_ref):
    """p_ref: (bm, K) bf16    w_ref: (K, Cp) bf16
       o_ref: (bm, Cp) bf16   s_ref: (1, 2, Cp) f32 (row0=sum, row1=sum_sq)."""
    acc = jnp.dot(p_ref[...], w_ref[...], preferred_element_type=jnp.float32)
    o_ref[...] = acc.astype(o_ref.dtype)
    ssum = jnp.sum(acc, axis=0, keepdims=True)           # (1, Cp)
    ssq = jnp.sum(acc * acc, axis=0, keepdims=True)      # (1, Cp)
    s_ref[...] = jnp.concatenate([ssum, ssq], axis=0)[None]


# ---------------------------------------------------------------------------
# Pass 2: y = relu(conv * scale + shift)  (BatchNorm folded into scale/shift).
# ---------------------------------------------------------------------------
def _bn_relu_kernel(x_ref, scale_ref, shift_ref, o_ref):
    x = x_ref[...].astype(jnp.float32)
    o_ref[...] = jnp.maximum(x * scale_ref[...] + shift_ref[...], 0.0)


def basic_conv2d(x_nchw, weight_oihw, gamma, beta, *, stride=1, padding=1,
                 dilation=1, block_m=256):
    """BasicConv2d forward: ReLU(BatchNorm2d(Conv2d(x, w, bias=False))).

    x_nchw:      (N, Cin, H, W) float32   (PyTorch layout)
    weight_oihw: (Cout, Cin, KH, KW) float32 (PyTorch Conv2d weight)
    gamma, beta: (Cout,) float32 BatchNorm affine (fresh BN: ones / zeros)
    Returns:     (N, Cout, Hout, Wout) float32
    """
    N, Cin, H, W = x_nchw.shape
    Cout, Cin_w, KH, KW = weight_oihw.shape
    assert Cin == Cin_w, "groups != 1 not supported"

    Hout = (H + 2 * padding - dilation * (KH - 1) - 1) // stride + 1
    Wout = (W + 2 * padding - dilation * (KW - 1) - 1) // stride + 1

    # ---- channels-last + bf16 BEFORE the 9x im2col expansion, spatial pad ----
    # TODO(synk): accept/return NHWC to drop both layout transposes when
    #             chaining BasicConv2d layers back to back.
    x = jnp.transpose(x_nchw, (0, 2, 3, 1)).astype(jnp.bfloat16)    # NHWC bf16
    x = jnp.pad(x, ((0, 0), (padding, padding), (padding, padding), (0, 0)))

    # ---- im2col (bf16): one row per output pixel, K = KH*KW*Cin, unpadded ----
    taps = []
    for kh in range(KH):
        for kw in range(KW):
            h0, w0 = kh * dilation, kw * dilation
            taps.append(x[:, h0:h0 + (Hout - 1) * stride + 1:stride,
                             w0:w0 + (Wout - 1) * stride + 1:stride, :])
    patches = jnp.concatenate(taps, axis=-1)                        # (N,Ho,Wo,K)

    M = N * Hout * Wout
    K = KH * KW * Cin
    Cp = _round_up(Cout, LANES)

    # ---- pass-1 row tile: multiple of 8, >=2 tiles (v7x megacore), and a
    #      per-step working set that fits even v7x's 64 MiB VMEM ----
    bm = max(8, min(_round_up(block_m, 8), _round_up(M, 8)))

    def p1_bytes(b):
        return (2 * b * K * 2        # patches: double-buffered bf16
                + K * Cp * 2         # weight:  single-buffered bf16
                + 2 * b * Cp * 2     # conv out: double-buffered bf16
                + 2 * 2 * Cp * 4)    # stats:    double-buffered f32

    while bm > 8 and p1_bytes(bm) > 40 * _MiB:
        bm = _round_up(bm // 2, 8)
    Mp = _round_up(M, bm)
    if Mp // bm == 1 and bm >= 16:           # give both v7x TensorCores work
        bm = _round_up(bm // 2, 8)
        Mp = _round_up(M, bm)
    n_tiles = Mp // bm

    patches = patches.reshape(M, K)
    if Mp > M:
        patches = jnp.pad(patches, ((0, Mp - M), (0, 0)))

    # weight rows ordered (kh, kw, cin) to match tap concatenation order; only
    # Cout is padded (lane-dense output); K stays unpadded (full-dim block).
    w = jnp.transpose(weight_oihw, (2, 3, 1, 0)).reshape(K, Cout)
    w = jnp.pad(w.astype(jnp.bfloat16), ((0, 0), (0, Cp - Cout)))

    conv_out, stats = pl.pallas_call(
        _conv_stats_kernel,
        out_shape=(jax.ShapeDtypeStruct((Mp, Cp), jnp.bfloat16),
                   jax.ShapeDtypeStruct((n_tiles, 2, Cp), jnp.float32)),
        grid_spec=pltpu.PrefetchScalarGridSpec(
            num_scalar_prefetch=0, grid=(n_tiles,),
            in_specs=[pl.BlockSpec((bm, K), lambda i: (i, 0)),
                      pl.BlockSpec((K, Cp), lambda i: (0, 0),
                                   pipeline_mode=pl.Buffered(1))],
            out_specs=(pl.BlockSpec((bm, Cp), lambda i: (i, 0)),
                       pl.BlockSpec((1, 2, Cp), lambda i: (i, 0, 0)))),
        compiler_params=pltpu.CompilerParams(
            dimension_semantics=("parallel",),
            vmem_limit_bytes=int(min(60 * _MiB,
                                     max(16 * _MiB, 2 * p1_bytes(bm))))),
    )(patches, w)

    # ---- global BN batch statistics (padded rows/channels contribute zeros;
    #      divide by the true element count M, so padding does not bias them).
    # TODO(synk): E[x^2]-E[x]^2 in f32 can lose precision when |mean| >> std;
    #             switch to mean-shifted per-tile partials if that regime matters.
    count = jnp.float32(M)
    mean = jnp.sum(stats[:, 0, :], axis=0) / count                  # (Cp,)
    ex2 = jnp.sum(stats[:, 1, :], axis=0) / count
    var = jnp.maximum(ex2 - mean * mean, 0.0)                       # biased var
    inv = lax.rsqrt(var + EPS)
    gamma_p = jnp.pad(gamma.reshape(-1).astype(jnp.float32), (0, Cp - Cout))
    beta_p = jnp.pad(beta.reshape(-1).astype(jnp.float32), (0, Cp - Cout))
    scale = (gamma_p * inv).reshape(1, Cp)
    shift = (beta_p - mean * gamma_p * inv).reshape(1, Cp)

    # ---- pass 2: pure memory-bound BN+ReLU; use a larger row tile ----
    bm2 = bm
    for d in range(2, n_tiles // 2 + 1):        # keep >= 2 tiles for megacore
        if n_tiles % d == 0 and bm * d <= 1024:
            bm2 = bm * d
    n_tiles2 = Mp // bm2
    p2_bytes = 2 * bm2 * Cp * 2 + 2 * bm2 * Cp * 4 + 4 * Cp * 4

    y = pl.pallas_call(
        _bn_relu_kernel,
        out_shape=jax.ShapeDtypeStruct((Mp, Cp), jnp.float32),
        grid_spec=pltpu.PrefetchScalarGridSpec(
            num_scalar_prefetch=0, grid=(n_tiles2,),
            in_specs=[pl.BlockSpec((bm2, Cp), lambda i: (i, 0)),
                      pl.BlockSpec((1, Cp), lambda i: (0, 0)),
                      pl.BlockSpec((1, Cp), lambda i: (0, 0))],
            out_specs=pl.BlockSpec((bm2, Cp), lambda i: (i, 0))),
        compiler_params=pltpu.CompilerParams(
            dimension_semantics=("parallel",),
            vmem_limit_bytes=int(min(60 * _MiB,
                                     max(16 * _MiB, 2 * p2_bytes)))),
    )(conv_out, scale, shift)

    y = y[:M, :Cout].reshape(N, Hout, Wout, Cout)
    return jnp.transpose(y, (0, 3, 1, 2))                           # back to NCHW


# ---------------------------------------------------------------------------
# Pure-JAX reference (same bf16 quantization choices) for a correctness check.
# ---------------------------------------------------------------------------
def _reference(x, w, gamma, beta, stride, padding, dilation):
    xb = x.astype(jnp.bfloat16).astype(jnp.float32)
    wb = w.astype(jnp.bfloat16).astype(jnp.float32)
    conv = lax.conv_general_dilated(
        xb, wb, window_strides=(stride, stride),
        padding=((padding, padding), (padding, padding)),
        rhs_dilation=(dilation, dilation),
        dimension_numbers=("NCHW", "OIHW", "NCHW"))
    mean = conv.mean(axis=(0, 2, 3), keepdims=True)
    var = ((conv - mean) ** 2).mean(axis=(0, 2, 3), keepdims=True)
    inv = lax.rsqrt(var + EPS)
    scale = gamma.reshape(1, -1, 1, 1) * inv
    shift = beta.reshape(1, -1, 1, 1) - mean * scale
    # mirror the kernel's bf16 conv intermediate (stats stay f32)
    conv_bf = conv.astype(jnp.bfloat16).astype(jnp.float32)
    return jnp.maximum(conv_bf * scale + shift, 0.0)


if __name__ == "__main__":
    key = jax.random.PRNGKey(0)
    N, Cin, H, W = 2, 4, 16, 16
    Cout, kernel, padding = 8, 3, 1

    kx, kw = jax.random.split(key)
    x = jax.random.normal(kx, (N, Cin, H, W), jnp.float32)
    fan_in = Cin * kernel * kernel
    bound = 1.0 / (fan_in ** 0.5)
    w = jax.random.uniform(kw, (Cout, Cin, kernel, kernel), jnp.float32,
                           -bound, bound)
    gamma = jnp.ones((Cout,), jnp.float32)    # fresh nn.BatchNorm2d affine
    beta = jnp.zeros((Cout,), jnp.float32)

    fwd = jax.jit(functools.partial(basic_conv2d, stride=1, padding=padding,
                                    dilation=1, block_m=256))
    out = jax.block_until_ready(fwd(x, w, gamma, beta))
    assert out.shape == (N, Cout, H, W), out.shape

    ref = _reference(x, w, gamma, beta, 1, padding, 1)
    err = float(jnp.max(jnp.abs(out - ref)))
    assert err < 2e-2, f"mismatch vs reference: max abs err {err}"

    print("KERNEL_OK")
</pallas_src>

<mosaic_0001>
module attributes {stable_mosaic.version = 11 : i64} {
  func.func @_conv_stats_kernel(%arg0: i32, %arg1: memref<256x36xbf16, #tpu.memory_space<vmem>>, %arg2: memref<36x128xbf16, #tpu.memory_space<vmem>>, %arg3: memref<256x128xbf16, #tpu.memory_space<vmem>>, %arg4: memref<1x2x128xf32, #tpu.memory_space<vmem>>) attributes {dimension_semantics = [#tpu.dimension_semantics<parallel>], iteration_bounds = array<i64: 2>, scalar_prefetch = 0 : i64, scratch_operands = 0 : i64, tpu.core_type = #tpu.core_type<tc>, window_params = [{transform_indices = @transform_0, window_bounds = array<i64: 256, 36>}, {pipeline_mode = #tpu.pipeline_mode<synchronous>, transform_indices = @transform_1, window_bounds = array<i64: 36, 128>}, {transform_indices = @transform_2, window_bounds = array<i64: 256, 128>}, {transform_indices = @transform_3, window_bounds = array<i64: 1, 2, 128>}]} {
    %c0 = arith.constant 0 : index
    %c0_0 = arith.constant 0 : index
    %0 = vector.load %arg1[%c0, %c0_0] : memref<256x36xbf16, #tpu.memory_space<vmem>>, vector<256x36xbf16>
    %c0_1 = arith.constant 0 : index
    %c0_2 = arith.constant 0 : index
    %1 = vector.load %arg2[%c0_1, %c0_2] : memref<36x128xbf16, #tpu.memory_space<vmem>>, vector<36x128xbf16>
    %cst = arith.constant dense<0.000000e+00> : vector<256x128xf32>
    %2 = tpu.matmul %0, %1, %cst {dimension_numbers = #tpu.dot_dimension_numbers<[1], [0], [0], [1], [0, 0, 1, 1], [], []>} : vector<256x36xbf16>, vector<36x128xbf16>, vector<256x128xf32> -> vector<256x128xf32>
    %3 = arith.truncf %2 : vector<256x128xf32> to vector<256x128xbf16>
    %c0_3 = arith.constant 0 : index
    %c0_4 = arith.constant 0 : index
    %4 = vector.load %arg3[%c0_3, %c0_4] : memref<256x128xbf16, #tpu.memory_space<vmem>>, vector<256x128xbf16>
    tpu.vector_store %arg3[%c0_3, %c0_4], %3 {strides = array<i32>} : memref<256x128xbf16, #tpu.memory_space<vmem>>, vector<256x128xbf16>,
    %cst_5 = arith.constant dense<0.000000e+00> : vector<128xf32>
    %5 = vector.multi_reduction <add>, %2, %cst_5 [0] : vector<256x128xf32> to vector<128xf32>
    %6 = vector.shape_cast %5 : vector<128xf32> to vector<1x128xf32>
    %7 = arith.mulf %2, %2 : vector<256x128xf32>
    %cst_6 = arith.constant dense<0.000000e+00> : vector<128xf32>
    %8 = vector.multi_reduction <add>, %7, %cst_6 [0] : vector<256x128xf32> to vector<128xf32>
    %9 = vector.shape_cast %8 : vector<128xf32> to vector<1x128xf32>
    %10 = tpu.concatenate %6, %9 in 0 : vector<1x128xf32>, vector<1x128xf32> -> vector<2x128xf32>
    %11 = vector.shape_cast %10 : vector<2x128xf32> to vector<1x2x128xf32>
    %c0_7 = arith.constant 0 : index
    %c0_8 = arith.constant 0 : index
    %c0_9 = arith.constant 0 : index
    %12 = vector.load %arg4[%c0_7, %c0_8, %c0_9] : memref<1x2x128xf32, #tpu.memory_space<vmem>>, vector<1x2x128xf32>
    tpu.vector_store %arg4[%c0_7, %c0_8, %c0_9], %11 {strides = array<i32>} : memref<1x2x128xf32, #tpu.memory_space<vmem>>, vector<1x2x128xf32>,
    return
  }
  func.func @transform_0(%arg0: i32) -> (i32, i32) {
    %c0_i32 = arith.constant 0 : i32
    %c0_i32_0 = arith.constant 0 : i32
    return %arg0, %c0_i32 : i32, i32
  }
  func.func @transform_1(%arg0: i32) -> (i32, i32) {
    %c0_i32 = arith.constant 0 : i32
    %c0_i32_0 = arith.constant 0 : i32
    %c0_i32_1 = arith.constant 0 : i32
    return %c0_i32, %c0_i32_0 : i32, i32
  }
  func.func @transform_2(%arg0: i32) -> (i32, i32) {
    %c0_i32 = arith.constant 0 : i32
    %c0_i32_0 = arith.constant 0 : i32
    return %arg0, %c0_i32 : i32, i32
  }
  func.func @transform_3(%arg0: i32) -> (i32, i32, i32) {
    %c0_i32 = arith.constant 0 : i32
    %c0_i32_0 = arith.constant 0 : i32
    %c0_i32_1 = arith.constant 0 : i32
    return %arg0, %c0_i32, %c0_i32_0 : i32, i32, i32
  }
}

module attributes {stable_mosaic.version = 11 : i64} {
  func.func @_bn_relu_kernel(%arg0: i32, %arg1: memref<256x128xbf16, #tpu.memory_space<vmem>>, %arg2: memref<1x128xf32, #tpu.memory_space<vmem>>, %arg3: memref<1x128xf32, #tpu.memory_space<vmem>>, %arg4: memref<256x128xf32, #tpu.memory_space<vmem>>) attributes {dimension_semantics = [#tpu.dimension_semantics<parallel>], iteration_bounds = array<i64: 2>, scalar_prefetch = 0 : i64, scratch_operands = 0 : i64, tpu.core_type = #tpu.core_type<tc>, window_params = [{transform_indices = @transform_0, window_bounds = array<i64: 256, 128>}, {pipeline_mode = #tpu.pipeline_mode<synchronous>, transform_indices = @transform_1, window_bounds = array<i64: 1, 128>}, {pipeline_mode = #tpu.pipeline_mode<synchronous>, transform_indices = @transform_2, window_bounds = array<i64: 1, 128>}, {transform_indices = @transform_3, window_bounds = array<i64: 256, 128>}]} {
    %c0 = arith.constant 0 : index
    %c0_0 = arith.constant 0 : index
    %0 = vector.load %arg1[%c0, %c0_0] : memref<256x128xbf16, #tpu.memory_space<vmem>>, vector<256x128xbf16>
    %1 = arith.extf %0 : vector<256x128xbf16> to vector<256x128xf32>
    %c0_1 = arith.constant 0 : index
    %c0_2 = arith.constant 0 : index
    %2 = vector.load %arg2[%c0_1, %c0_2] : memref<1x128xf32, #tpu.memory_space<vmem>>, vector<1x128xf32>
    %3 = vector.broadcast %2 : vector<1x128xf32> to vector<256x128xf32>
    %4 = arith.mulf %1, %3 : vector<256x128xf32>
    %c0_3 = arith.constant 0 : index
    %c0_4 = arith.constant 0 : index
    %5 = vector.load %arg3[%c0_3, %c0_4] : memref<1x128xf32, #tpu.memory_space<vmem>>, vector<1x128xf32>
    %6 = vector.broadcast %5 : vector<1x128xf32> to vector<256x128xf32>
    %7 = arith.addf %4, %6 : vector<256x128xf32>
    %cst = arith.constant 0.000000e+00 : f32
    %8 = vector.broadcast %cst : f32 to vector<256x128xf32>
    %9 = arith.maximumf %7, %8 : vector<256x128xf32>
    %c0_5 = arith.constant 0 : index
    %c0_6 = arith.constant 0 : index
    %10 = vector.load %arg4[%c0_5, %c0_6] : memref<256x128xf32, #tpu.memory_space<vmem>>, vector<256x128xf32>
    tpu.vector_store %arg4[%c0_5, %c0_6], %9 {strides = array<i32>} : memref<256x128xf32, #tpu.memory_space<vmem>>, vector<256x128xf32>,
    return
  }
  func.func @transform_0(%arg0: i32) -> (i32, i32) {
    %c0_i32 = arith.constant 0 : i32
    %c0_i32_0 = arith.constant 0 : i32
    return %arg0, %c0_i32 : i32, i32
  }
  func.func @transform_1(%arg0: i32) -> (i32, i32) {
    %c0_i32 = arith.constant 0 : i32
    %c0_i32_0 = arith.constant 0 : i32
    %c0_i32_1 = arith.constant 0 : i32
    return %c0_i32, %c0_i32_0 : i32, i32
  }
  func.func @transform_2(%arg0: i32) -> (i32, i32) {
    %c0_i32 = arith.constant 0 : i32
    %c0_i32_0 = arith.constant 0 : i32
    %c0_i32_1 = arith.constant 0 : i32
    return %c0_i32, %c0_i32_0 : i32, i32
  }
  func.func @transform_3(%arg0: i32) -> (i32, i32) {
    %c0_i32 = arith.constant 0 : i32
    %c0_i32_0 = arith.constant 0 : i32
    return %arg0, %c0_i32 : i32, i32
  }
}

</mosaic_0001>

<bundles_post_ra>
// kernel: basic_conv2d.3
= control target key start
LH: loop header
LB: loop body
LE: loop exit
PB: predicated region body
PF: predicated region fallthrough
CT: control target
= control target key end

     0   :  { %s564_s12 = smov 0   ;;  %s711_s0 = inlined_call_operand.vmem [shape: bf16[512,128], index: 0, kind: input, shape index: {}]   ;;  %s712_s1 = inlined_call_operand.vmem [shape: f32[1,128], index: 1, kind: input, shape index: {}]   ;;  %s713_s2 = inlined_call_operand.vmem [shape: f32[1,128], index: 2, kind: input, shape index: {}]   ;;  %s714_s3 = inlined_call_operand.vmem [shape: f32[512,128], index: 3, kind: output, shape index: {}]  }
   0x1 LB: > { %s436_s13 = sadd.s32 4294967295, %s542_s12   ;;  %p440_p0 = scmp.ge.s32.totalorder %s542_s12, 1  ;;  %s542_s12 = sphi %s564_s12, %s13_s12  }
   0x2   : > { %p138_p1 = scmp.lt.s32.totalorder %s542_s12, 3 }
   0x4   : > { %p139_p2 = pnand %p440_p0, %p138_p1 }
   0x5   : > { %s441_s14 = sshll.u32 (!%p139_p2), %s436_s13, 5  ;;  %v583_v0 = vld [vmem:[%s712_s1] ss:$0 sm:$0xff] (!%p139_p2) }
   0x6   : > { %142 = sbr.rel (%p139_p2) target bundleno = 53 (0x35), region = 32  ;;  %p163_p3 = scmp.lt.s32.totalorder (!%p139_p2), %s441_s14, 63  ;;  %v592_v9 = vld [vmem:[%s713_s2] ss:$0 sm:$0xff] (!%p139_p2) }
   0xd   : > { %s716_s14 = smov (!%p163_p3, %s441_s14), 63 }
   0xe   : > { %s442_s15 = sshll.u32 %s716_s14, 2  ;;  %s444_s23 = sshll.u32 %s716_s14, 3 }
   0xf   : > { %s578_s18 = scalar_lea.vmem %s711_s0, %s442_s15  ;;  %s610_s26 = scalar_lea.vmem %s714_s3, %s444_s23 }
  0x10   : > { %v450_v1 = vld [vmem:[%s578_s18] sm:$0xff]   ;;  %v513_v2 = vld [vmem:[%s578_s18 + $0x8] sm:$0xff]   ;;  %v514_v3 = vld [vmem:[%s578_s18 + $0x10] sm:$0xff]  }
  0x11   : > { %v451_v4 = vunpack.c.l.bf16 %v450_v1  ;;  %v452_v5 = vunpack.c.h.bf16 %v450_v1  ;;  %v455_v6 = vunpack.c.l.bf16 %v513_v2  ;;  %v456_v7 = vunpack.c.h.bf16 %v513_v2  ;;  %v515_v8 = vld [vmem:[%s578_s18 + $0x18] sm:$0xff]   ;;  %v516_v30 = vld [vmem:[%s578_s18 + $0x20] sm:$0xff]   ;;  %v517_v31 = vld [vmem:[%s578_s18 + $0x28] sm:$0xff]  }
  0x12   : > { %v459_v10 = vunpack.c.l.bf16 %v514_v3  ;;  %v460_v11 = vunpack.c.h.bf16 %v514_v3  ;;  %v463_v12 = vunpack.c.l.bf16 %v515_v8  ;;  %v464_v13 = vunpack.c.h.bf16 %v515_v8  ;;  %v518_v36 = vld [vmem:[%s578_s18 + $0x30] sm:$0xff]   ;;  %v519_v37 = vld [vmem:[%s578_s18 + $0x38] sm:$0xff]   ;;  %v520_v3 = vld [vmem:[%s578_s18 + $0x40] sm:$0xff]  }
  0x13   : > { %v245_v14 = vmul.f32 %v451_v4, %v583_v0  ;;  %v246_v15 = vmul.f32 %v452_v5, %v583_v0  ;;  %v247_v16 = vmul.f32 %v455_v6, %v583_v0  ;;  %v248_v17 = vmul.f32 %v456_v7, %v583_v0  ;;  %v521_v4 = vld [vmem:[%s578_s18 + $0x48] sm:$0xff]  }
  0x14   : > { %v249_v18 = vmul.f32 %v459_v10, %v583_v0  ;;  %v250_v19 = vmul.f32 %v460_v11, %v583_v0  ;;  %v251_v20 = vmul.f32 %v463_v12, %v583_v0  ;;  %v252_v21 = vmul.f32 %v464_v13, %v583_v0  ;;  %v522_v10 = vld [vmem:[%s578_s18 + $0x50] sm:$0xff]   ;;  %v523_v11 = vld [vmem:[%s578_s18 + $0x58] sm:$0xff]  }
  0x15   : > { %v284_v22 = vadd.f32 %v592_v9, %v245_v14  ;;  %v285_v23 = vadd.f32 %v592_v9, %v246_v15  ;;  %v286_v24 = vadd.f32 %v592_v9, %v247_v16  ;;  %v287_v25 = vadd.f32 %v592_v9, %v248_v17 }
  0x16   : > { %v288_v26 = vadd.f32 %v592_v9, %v249_v18  ;;  %v289_v27 = vadd.f32 %v592_v9, %v250_v19  ;;  %v290_v28 = vadd.f32 %v592_v9, %v251_v20  ;;  %v291_v29 = vadd.f32 %v592_v9, %v252_v21 }
  0x17   : > { %v316_v32 = vmax.f32 %v284_v22, 0.0  ;;  %v317_v33 = vmax.f32 %v285_v23, 0.0  ;;  %v318_v34 = vmax.f32 %v286_v24, 0.0  ;;  %v319_v35 = vmax.f32 %v287_v25, 0.0 }
  0x18   : > { %v320_v38 = vmax.f32 %v288_v26, 0.0  ;;  %v321_v39 = vmax.f32 %v289_v27, 0.0  ;;  %v322_v40 = vmax.f32 %v290_v28, 0.0  ;;  %v323_v41 = vmax.f32 %v291_v29, 0.0 }
  0x19   : > { %348 = vst [vmem:[%s610_s26] sm:$0xff] %v316_v32  ;;  %349 = vst [vmem:[%s610_s26 + $0x8] sm:$0xff] %v317_v33  ;;  %v467_v42 = vunpack.c.l.bf16 %v516_v30  ;;  %v468_v43 = vunpack.c.h.bf16 %v516_v30  ;;  %v471_v44 = vunpack.c.l.bf16 %v517_v31  ;;  %v472_v45 = vunpack.c.h.bf16 %v517_v31 }
  0x1a   : > { %350 = vst [vmem:[%s610_s26 + $0x10] sm:$0xff] %v318_v34  ;;  %351 = vst [vmem:[%s610_s26 + $0x18] sm:$0xff] %v319_v35  ;;  %v475_v46 = vunpack.c.l.bf16 %v518_v36  ;;  %v476_v47 = vunpack.c.h.bf16 %v518_v36  ;;  %v479_v48 = vunpack.c.l.bf16 %v519_v37  ;;  %v480_v49 = vunpack.c.h.bf16 %v519_v37 }
  0x1b   : > { %352 = vst [vmem:[%s610_s26 + $0x20] sm:$0xff] %v320_v38  ;;  %353 = vst [vmem:[%s610_s26 + $0x28] sm:$0xff] %v321_v39  ;;  %v253_v50 = vmul.f32 %v467_v42, %v583_v0  ;;  %v254_v51 = vmul.f32 %v468_v43, %v583_v0  ;;  %v255_v52 = vmul.f32 %v471_v44, %v583_v0  ;;  %v483_v16 = vunpack.c.l.bf16 %v520_v3 }
  0x1c   : > { %354 = vst [vmem:[%s610_s26 + $0x30] sm:$0xff] %v322_v40  ;;  %355 = vst [vmem:[%s610_s26 + $0x38] sm:$0xff] %v323_v41  ;;  %v256_v53 = vmul.f32 %v472_v45, %v583_v0  ;;  %v257_v54 = vmul.f32 %v475_v46, %v583_v0  ;;  %v258_v55 = vmul.f32 %v476_v47, %v583_v0  ;;  %v484_v17 = vunpack.c.h.bf16 %v520_v3  ;;  %v524_v40 = vld [vmem:[%s578_s18 + $0x60] sm:$0xff]   ;;  %v525_v41 = vld [vmem:[%s578_s18 + $0x68] sm:$0xff]  }
  0x1d   : > { %v259_v56 = vmul.f32 %v479_v48, %v583_v0  ;;  %v260_v57 = vmul.f32 %v480_v49, %v583_v0  ;;  %v292_v58 = vadd.f32 %v592_v9, %v253_v50  ;;  %v293_v59 = vadd.f32 %v592_v9, %v254_v51  ;;  %v526_v46 = vld [vmem:[%s578_s18 + $0x70] sm:$0xff]   ;;  %v527_v47 = vld [vmem:[%s578_s18 + $0x78] sm:$0xff]  }
  0x1e   : > { %v294_v60 = vadd.f32 %v592_v9, %v255_v52  ;;  %v295_v61 = vadd.f32 %v592_v9, %v256_v53  ;;  %v296_v62 = vadd.f32 %v592_v9, %v257_v54  ;;  %v297_v63 = vadd.f32 %v592_v9, %v258_v55 }
  0x1f   : > { %v298_v1 = vadd.f32 %v592_v9, %v259_v56  ;;  %v299_v2 = vadd.f32 %v592_v9, %v260_v57  ;;  %v324_v5 = vmax.f32 %v292_v58, 0.0  ;;  %v325_v6 = vmax.f32 %v293_v59, 0.0 }
  0x20   : > { %v326_v7 = vmax.f32 %v294_v60, 0.0  ;;  %v327_v8 = vmax.f32 %v295_v61, 0.0  ;;  %v328_v12 = vmax.f32 %v296_v62, 0.0  ;;  %v329_v13 = vmax.f32 %v297_v63, 0.0 }
  0x21   : > { %v330_v14 = vmax.f32 %v298_v1, 0.0  ;;  %v331_v15 = vmax.f32 %v299_v2, 0.0  ;;  %356 = vst [vmem:[%s610_s26 + $0x40] sm:$0xff] %v324_v5  ;;  %357 = vst [vmem:[%s610_s26 + $0x48] sm:$0xff] %v325_v6  ;;  %v487_v18 = vunpack.c.l.bf16 %v521_v4  ;;  %v488_v19 = vunpack.c.h.bf16 %v521_v4 }
  0x22   : > { %358 = vst [vmem:[%s610_s26 + $0x50] sm:$0xff] %v326_v7  ;;  %359 = vst [vmem:[%s610_s26 + $0x58] sm:$0xff] %v327_v8  ;;  %v491_v20 = vunpack.c.l.bf16 %v522_v10  ;;  %v492_v21 = vunpack.c.h.bf16 %v522_v10  ;;  %v495_v22 = vunpack.c.l.bf16 %v523_v11  ;;  %v496_v23 = vunpack.c.h.bf16 %v523_v11 }
  0x23   : > { %360 = vst [vmem:[%s610_s26 + $0x60] sm:$0xff] %v328_v12  ;;  %361 = vst [vmem:[%s610_s26 + $0x68] sm:$0xff] %v329_v13  ;;  %v261_v24 = vmul.f32 %v483_v16, %v583_v0  ;;  %v262_v25 = vmul.f32 %v484_v17, %v583_v0  ;;  %v263_v26 = vmul.f32 %v487_v18, %v583_v0  ;;  %v499_v52 = vunpack.c.l.bf16 %v524_v40 }
  0x24   : > { %362 = vst [vmem:[%s610_s26 + $0x70] sm:$0xff] %v330_v14  ;;  %363 = vst [vmem:[%s610_s26 + $0x78] sm:$0xff] %v331_v15  ;;  %v264_v27 = vmul.f32 %v488_v19, %v583_v0  ;;  %v265_v28 = vmul.f32 %v491_v20, %v583_v0  ;;  %v266_v29 = vmul.f32 %v492_v21, %v583_v0  ;;  %v500_v53 = vunpack.c.h.bf16 %v524_v40 }
  0x25   : > { %v267_v30 = vmul.f32 %v495_v22, %v583_v0  ;;  %v268_v31 = vmul.f32 %v496_v23, %v583_v0  ;;  %v300_v32 = vadd.f32 %v592_v9, %v261_v24  ;;  %v301_v33 = vadd.f32 %v592_v9, %v262_v25 }
  0x26   : > { %v302_v34 = vadd.f32 %v592_v9, %v263_v26  ;;  %v303_v35 = vadd.f32 %v592_v9, %v264_v27  ;;  %v304_v36 = vadd.f32 %v592_v9, %v265_v28  ;;  %v305_v37 = vadd.f32 %v592_v9, %v266_v29 }
  0x27   : > { %v306_v38 = vadd.f32 %v592_v9, %v267_v30  ;;  %v307_v39 = vadd.f32 %v592_v9, %v268_v31  ;;  %v332_v42 = vmax.f32 %v300_v32, 0.0  ;;  %v333_v43 = vmax.f32 %v301_v33, 0.0 }
  0x28   : > { %v334_v44 = vmax.f32 %v302_v34, 0.0  ;;  %v335_v45 = vmax.f32 %v303_v35, 0.0  ;;  %v336_v48 = vmax.f32 %v304_v36, 0.0  ;;  %v337_v49 = vmax.f32 %v305_v37, 0.0 }
  0x29   : > { %v338_v50 = vmax.f32 %v306_v38, 0.0  ;;  %v339_v51 = vmax.f32 %v307_v39, 0.0  ;;  %364 = vst [vmem:[%s610_s26 + $0x80] sm:$0xff] %v332_v42  ;;  %365 = vst [vmem:[%s610_s26 + $0x88] sm:$0xff] %v333_v43  ;;  %v503_v54 = vunpack.c.l.bf16 %v525_v41  ;;  %v504_v55 = vunpack.c.h.bf16 %v525_v41 }
  0x2a   : > { %366 = vst [vmem:[%s610_s26 + $0x90] sm:$0xff] %v334_v44  ;;  %367 = vst [vmem:[%s610_s26 + $0x98] sm:$0xff] %v335_v45  ;;  %v507_v56 = vunpack.c.l.bf16 %v526_v46  ;;  %v508_v57 = vunpack.c.h.bf16 %v526_v46  ;;  %v511_v58 = vunpack.c.l.bf16 %v527_v47  ;;  %v512_v59 = vunpack.c.h.bf16 %v527_v47 }
  0x2b   : > { %368 = vst [vmem:[%s610_s26 + $0xa0] sm:$0xff] %v336_v48  ;;  %369 = vst [vmem:[%s610_s26 + $0xa8] sm:$0xff] %v337_v49  ;;  %v269_v60 = vmul.f32 %v499_v52, %v583_v0  ;;  %v270_v61 = vmul.f32 %v500_v53, %v583_v0  ;;  %v271_v62 = vmul.f32 %v503_v54, %v583_v0 }
  0x2c   : > { %370 = vst [vmem:[%s610_s26 + $0xb0] sm:$0xff] %v338_v50  ;;  %371 = vst [vmem:[%s610_s26 + $0xb8] sm:$0xff] %v339_v51  ;;  %v272_v63 = vmul.f32 %v504_v55, %v583_v0  ;;  %v273_v1 = vmul.f32 %v507_v56, %v583_v0  ;;  %v274_v2 = vmul.f32 %v508_v57, %v583_v0 }
  0x2d   : > { %v275_v3 = vmul.f32 %v511_v58, %v583_v0  ;;  %v276_v4 = vmul.f32 %v512_v59, %v583_v0  ;;  %v308_v5 = vadd.f32 %v592_v9, %v269_v60  ;;  %v309_v6 = vadd.f32 %v592_v9, %v270_v61 }
  0x2e   : > { %v310_v7 = vadd.f32 %v592_v9, %v271_v62  ;;  %v311_v8 = vadd.f32 %v592_v9, %v272_v63  ;;  %v312_v10 = vadd.f32 %v592_v9, %v273_v1  ;;  %v313_v11 = vadd.f32 %v592_v9, %v274_v2 }
  0x2f   : > { %v314_v0 = vadd.f32 %v592_v9, %v275_v3  ;;  %v315_v12 = vadd.f32 %v592_v9, %v276_v4  ;;  %v340_v13 = vmax.f32 %v308_v5, 0.0  ;;  %v341_v14 = vmax.f32 %v309_v6, 0.0 }
  0x30   : > { %v342_v15 = vmax.f32 %v310_v7, 0.0  ;;  %v343_v16 = vmax.f32 %v311_v8, 0.0  ;;  %v344_v17 = vmax.f32 %v312_v10, 0.0  ;;  %v345_v18 = vmax.f32 %v313_v11, 0.0 }
  0x31   : > { %v346_v19 = vmax.f32 %v314_v0, 0.0  ;;  %v347_v20 = vmax.f32 %v315_v12, 0.0  ;;  %372 = vst [vmem:[%s610_s26 + $0xc0] sm:$0xff] %v340_v13  ;;  %373 = vst [vmem:[%s610_s26 + $0xc8] sm:$0xff] %v341_v14 }
  0x32   : > { %374 = vst [vmem:[%s610_s26 + $0xd0] sm:$0xff] %v342_v15  ;;  %375 = vst [vmem:[%s610_s26 + $0xd8] sm:$0xff] %v343_v16 }
  0x33   : > { %376 = vst [vmem:[%s610_s26 + $0xe0] sm:$0xff] %v344_v17  ;;  %377 = vst [vmem:[%s610_s26 + $0xe8] sm:$0xff] %v345_v18 }
  0x34   : > { %378 = vst [vmem:[%s610_s26 + $0xf0] sm:$0xff] %v346_v19  ;;  %379 = vst [vmem:[%s610_s26 + $0xf8] sm:$0xff] %v347_v20 }
  0x35 PF: > { %s13_s12 = sadd.s32 1, %s542_s12  }
  0x36   : > { %p10_p4 = scmp.ge.s32.totalorder %s13_s12, 4  }
  0x38   :  { %12 = sbr.rel (!%p10_p4) target bundleno = 1 (0x1), region = 62 }

// kernel: basic_conv2d.2
= control target key start
LH: loop header
LB: loop body
LE: loop exit
PB: predicated region body
PF: predicated region fallthrough
CT: control target
= control target key end

     0   :  { %s1214_s12 = smov 0   ;;  %s1373_s0 = inlined_call_operand.vmem [shape: bf16[512,36], index: 0, kind: input, shape index: {}]   ;;  %s1374_s1 = inlined_call_operand.vmem [shape: bf16[36,128], index: 1, kind: input, shape index: {}]   ;;  %s1375_s2 = inlined_call_operand.vmem [shape: bf16[512,128], index: 2, kind: output, shape index: {0}]   ;;  %s1376_s3 = inlined_call_operand.vmem [shape: f32[2,2,128], index: 3, kind: output, shape index: {1}]  }
   0x1 LB: > { %s1220_s13 = sadd.s32 4294967295, %s1192_s12   ;;  %p892_p0 = scmp.ge.s32.totalorder %s1192_s12, 1  ;;  %s1192_s12 = sphi %s1214_s12, %s14_s12  }
   0x2   : > { %p141_p1 = scmp.lt.s32.totalorder %s1192_s12, 3 }
   0x4   : > { %p142_p2 = pnand %p892_p0, %p141_p1 }
   0x5   : > { %v1167_v0 = vld [vmem:[%s1374_s1] sm:$0xff] (!%p142_p2)   ;;  %v1168_v1 = vld [vmem:[%s1374_s1 + $0x8] sm:$0xff] (!%p142_p2)   ;;  %s893_s18 = sshll.u32 (!%p142_p2), %s1220_s13, 5  ;;  %v1169_v2 = vld [vmem:[%s1374_s1 + $0x10] ss:$0 sps:$4 sm:$0x33] (!%p142_p2)  }
   0x6   : > { %145 = sbr.rel (%p142_p2) target bundleno = 311 (0x137), region = 28  ;;  %1113 = vmatprep.subr.bf16.mxu0 (!%p142_p2), %v1167_v0  ;;  %p170_p3 = scmp.lt.s32.totalorder (!%p142_p2), %s893_s18, 63  ;;  %1151 = vmatprep.subr.bf16.mxu1 (!%p142_p2), %v1167_v0  ;;  %vm367_vm0 = vcmask (!%p142_p2), 1041408   ;;  %vm318_vm1 = vcmask (!%p142_p2), 293888   ;;  %vm798_vm2 = vcmask (!%p142_p2), 1040384  }
   0x7   : > { %1114 = vmatpush3.bf16.msra.mxu0 (!%p142_p2), %v1167_v0  ;;  %1154 = vmatpush3.bf16.msra.mxu1 (!%p142_p2), %v1167_v0  ;;  %v369_v3 = vsel (!%p142_p2), %vm367_vm0, %v1169_v2, 0  ;;  %p181_p4 = scmp.lt.s32.totalorder (!%p142_p2), %s1220_s13, 1 }
   0x8   : > { %1115 = vmatprep.subr.bf16.mxu0 (!%p142_p2), %v1168_v1  ;;  %1152 = vmatprep.subr.bf16.mxu1 (!%p142_p2), %v1168_v1 }
   0xb   : > { %1116 = vmatpush3.bf16.msra.mxu0 (!%p142_p2), %v1168_v1  ;;  %1155 = vmatpush3.bf16.msra.mxu1 (!%p142_p2), %v1168_v1 }
   0xc   : > { %1157 = vmatprep.subr.msk.bf16.mxu0 (!%p142_p2), %vm367_vm0, %v1169_v2  ;;  %1158 = vmatprep.subr.msk.bf16.mxu1 (!%p142_p2), %vm367_vm0, %v1169_v2 }
   0xd   : > { %s1378_s18 = smov (!%p170_p3, %s893_s18), 63  ;;  %s1380_s13 = smov (!%p181_p4, %s1220_s13), 1 }
   0xe   : > { %s894_s21 = sshll.u32 %s1378_s18, 2  ;;  %s897_s28 = sshll.u32 %s1380_s13, 1 }
   0xf   : > { %s1242_s24 = scalar_lea.vmem %s1373_s0, %s894_s21  ;;  %1118 = vmatpush3.bf16.msra.mxu0 %v369_v3  ;;  %1156 = vmatpush3.bf16.msra.mxu1 %v369_v3  ;;  %s1281_s27 = scalar_lea.vmem %s1375_s2, %s894_s21 }
  0x10   : > { %v1170_v4 = vld [vmem:[%s1242_s24] sm:$0xff]   ;;  %v1171_v5 = vld [vmem:[%s1242_s24 + $0x8] sm:$0xff]   ;;  %v1172_v6 = vld [vmem:[%s1242_s24 + $0x10] sm:$0xff]   ;;  %s184_s4 = scalar_lea.vmem %s1376_s3, %s897_s28 }
  0x11   : > { %1119 = vmatprep.mubr.msk.bf16.mxu0 %vm318_vm1, %v1170_v4  ;;  %v1173_v7 = vld [vmem:[%s1242_s24 + $0x18] sm:$0xff]   ;;  %v1178_v8 = vld [vmem:[%s1242_s24 + $0x40] sm:$0xff]   ;;  %v1179_v9 = vld [vmem:[%s1242_s24 + $0x48] sm:$0xff]  }
  0x12   : > { %1120 = vmatmul.mubr.msk.bf16.vlgmr.msra.gmra.mrb[0].mxu0 %vm318_vm1, %v1171_v5  ;;  %1135 = vmatprep.mubr.msk.bf16.mxu1 %vm318_vm1, %v1178_v8  ;;  %v1180_v10 = vld [vmem:[%s1242_s24 + $0x50] sm:$0xff]   ;;  %v1174_v11 = vld [vmem:[%s1242_s24 + $0x20] sm:$0xff]   ;;  %v1181_v12 = vld [vmem:[%s1242_s24 + $0x58] sm:$0xff]  }
  0x13   : > { %1123 = vmatprep.mubr.msk.bf16.mxu0 %vm318_vm1, %v1172_v6  ;;  %1136 = vmatmul.mubr.msk.bf16.vlgmr.msra.gmra.mrb[0].mxu1 %vm318_vm1, %v1179_v9  ;;  %v1182_v13 = vld [vmem:[%s1242_s24 + $0x60] sm:$0xff]   ;;  %v1175_v14 = vld [vmem:[%s1242_s24 + $0x28] sm:$0xff]   ;;  %v1176_v15 = vld [vmem:[%s1242_s24 + $0x30] sm:$0xff]  }
  0x14   : > { %1139 = vmatprep.mubr.msk.bf16.mxu1 %vm318_vm1, %v1180_v10  ;;  %v1183_v16 = vld [vmem:[%s1242_s24 + $0x68] sm:$0xff]   ;;  %v1184_v17 = vld [vmem:[%s1242_s24 + $0x70] sm:$0xff]   ;;  %v1177_v18 = vld [vmem:[%s1242_s24 + $0x38] sm:$0xff]  }
  0x15   : > { %v1185_v19 = vld [vmem:[%s1242_s24 + $0x78] sm:$0xff]  }
  0x1a   : > { %1124 = vmatmul.mubr.msk.bf16.gmra.mrb[4].mxu0 %vm318_vm1, %v1173_v7 }
  0x1b   : > { %1127 = vmatprep.mubr.msk.bf16.mxu0 %vm318_vm1, %v1174_v11  ;;  %1140 = vmatmul.mubr.msk.bf16.gmra.mrb[4].mxu1 %vm318_vm1, %v1181_v12 }
  0x1c   : > { %1143 = vmatprep.mubr.msk.bf16.mxu1 %vm318_vm1, %v1182_v13 }
  0x22   : > { %1128 = vmatmul.mubr.msk.bf16.gmra.mrb[8].mxu0 %vm318_vm1, %v1175_v14 }
  0x23   : > { %1131 = vmatprep.mubr.msk.bf16.mxu0 %vm318_vm1, %v1176_v15  ;;  %1144 = vmatmul.mubr.msk.bf16.gmra.mrb[8].mxu1 %vm318_vm1, %v1183_v16 }
  0x24   : > { %1147 = vmatprep.mubr.msk.bf16.mxu1 %vm318_vm1, %v1184_v17 }
  0x2a   : > { %1132 = vmatmul.mubr.msk.bf16.gmra.mrb[12].mxu0 %vm318_vm1, %v1177_v18 }
  0x2b   : > { %1148 = vmatmul.mubr.msk.bf16.gmra.mrb[12].mxu1 %vm318_vm1, %v1185_v19 }
  0xe5   : > { %v1121_v20 = vpop.f32.mrb[0].mxu0 }
  0xe6   : > { %v405_v21 = vpop.f32.mrb[1].mxu0  ;;  %v1284_v29 = vpop.f32.mrb[0].mxu1  ;;  %v731_v30 = vmul.f32 %v1121_v20, %v1121_v20 }
  0xe7   : > { %v1122_v22 = vpop.f32.mrb[2].mxu0  ;;  %v729_v25 = vmul.f32 %v405_v21, %v405_v21  ;;  %v1287_v33 = vpop.f32.mrb[1].mxu1 }
  0xe8   : > { %v1007_v23 = vpack.c.bf16 %v1122_v22, %v1121_v20  ;;  %v408_v24 = vpop.f32.mrb[3].mxu0  ;;  %v1289_v34 = vpop.f32.mrb[2].mxu1  ;;  %v732_v35 = vmul.f32 %v1122_v22, %v1122_v22 }
  0xe9   : > { %v1002_v26 = vpack.c.bf16 %v408_v24, %v405_v21  ;;  %v692_v27 = vadd.f32 %v408_v24, %v405_v21  ;;  %v730_v28 = vmul.f32 %v408_v24, %v408_v24  ;;  %v1047_v39 = vpack.c.bf16 %v1289_v34, %v1284_v29  ;;  %v1293_v40 = vpop.f32.mrb[3].mxu1 }
  0xea   : > { %1079 = vst [vmem:[%s1281_s27 + $0x8] sm:$0xff] %v1007_v23   ;;  %v1042_v42 = vpack.c.bf16 %v1293_v40, %v1287_v33 }
  0xeb   : > { %1003 = vst [vmem:[%s1281_s27] sm:$0xff] %v1002_v26   ;;  %v693_v31 = vadd.f32 %v1121_v20, %v692_v27  ;;  %v761_v32 = vadd.f32 %v730_v28, %v729_v25  ;;  %1087 = vst [vmem:[%s1281_s27 + $0x48] sm:$0xff] %v1047_v39  }
  0xec   : > { %1086 = vst [vmem:[%s1281_s27 + $0x40] sm:$0xff] %v1042_v42  }
  0xed   : > { %v762_v36 = vadd.f32 %v761_v32, %v731_v30  ;;  %v1125_v37 = vpop.f32.mrb[4].mxu0  ;;  %v694_v38 = vadd.f32 %v1122_v22, %v693_v31 }
  0xee   : > { %v421_v41 = vpop.f32.mrb[5].mxu0  ;;  %v1300_v53 = vpop.f32.mrb[4].mxu1  ;;  %v735_v54 = vmul.f32 %v1125_v37, %v1125_v37 }
  0xef   : > { %v695_v43 = vadd.f32 %v694_v38, %v421_v41  ;;  %v733_v44 = vmul.f32 %v421_v41, %v421_v41  ;;  %v763_v45 = vadd.f32 %v762_v36, %v732_v35  ;;  %v1126_v46 = vpop.f32.mrb[6].mxu0  ;;  %v1303_v57 = vpop.f32.mrb[5].mxu1 }
  0xf0   : > { %v1017_v47 = vpack.c.bf16 %v1126_v46, %v1125_v37  ;;  %v424_v48 = vpop.f32.mrb[7].mxu0  ;;  %v1305_v58 = vpop.f32.mrb[6].mxu1  ;;  %v736_v59 = vmul.f32 %v1126_v46, %v1126_v46 }
  0xf1   : > { %v764_v49 = vadd.f32 %v763_v45, %v733_v44  ;;  %v1012_v50 = vpack.c.bf16 %v424_v48, %v421_v41  ;;  %v696_v51 = vadd.f32 %v695_v43, %v424_v48  ;;  %v734_v52 = vmul.f32 %v424_v48, %v424_v48  ;;  %v1309_v0 = vpop.f32.mrb[7].mxu1 }
  0xf2   : > { %1081 = vst [vmem:[%s1281_s27 + $0x18] sm:$0xff] %v1017_v47   ;;  %v1057_v63 = vpack.c.bf16 %v1305_v58, %v1300_v53  ;;  %v1052_v2 = vpack.c.bf16 %v1309_v0, %v1303_v57 }
  0xf3   : > { %1080 = vst [vmem:[%s1281_s27 + $0x10] sm:$0xff] %v1012_v50   ;;  %v697_v55 = vadd.f32 %v1125_v37, %v696_v51  ;;  %v765_v56 = vadd.f32 %v764_v49, %v734_v52 }
  0xf4   : > { %1089 = vst [vmem:[%s1281_s27 + $0x58] sm:$0xff] %v1057_v63   ;;  %1088 = vst [vmem:[%s1281_s27 + $0x50] sm:$0xff] %v1052_v2   ;;  %v748_v2 = vmul.f32 %v1289_v34, %v1289_v34 }
  0xf5   : > { %v766_v60 = vadd.f32 %v765_v56, %v735_v54  ;;  %v1129_v61 = vpop.f32.mrb[8].mxu0  ;;  %v698_v62 = vadd.f32 %v1126_v46, %v697_v55  ;;  %v745_v46 = vmul.f32 %v1287_v33, %v1287_v33 }
  0xf6   : > { %v437_v1 = vpop.f32.mrb[9].mxu0  ;;  %v1316_v13 = vpop.f32.mrb[8].mxu1  ;;  %v739_v14 = vmul.f32 %v1129_v61, %v1129_v61 }
  0xf7   : > { %v699_v3 = vadd.f32 %v698_v62, %v437_v1  ;;  %v737_v4 = vmul.f32 %v437_v1, %v437_v1  ;;  %v767_v5 = vadd.f32 %v766_v60, %v736_v59  ;;  %v1130_v6 = vpop.f32.mrb[10].mxu0  ;;  %v1319_v17 = vpop.f32.mrb[9].mxu1  ;;  %v747_v62 = vmul.f32 %v1284_v29, %v1284_v29 }
  0xf8   : > { %v1027_v7 = vpack.c.bf16 %v1130_v6, %v1129_v61  ;;  %v440_v8 = vpop.f32.mrb[11].mxu0  ;;  %v1321_v18 = vpop.f32.mrb[10].mxu1  ;;  %v740_v19 = vmul.f32 %v1130_v6, %v1130_v6 }
  0xf9   : > { %v768_v9 = vadd.f32 %v767_v5, %v737_v4  ;;  %v1022_v10 = vpack.c.bf16 %v440_v8, %v437_v1  ;;  %v700_v11 = vadd.f32 %v699_v3, %v440_v8  ;;  %v738_v12 = vmul.f32 %v440_v8, %v440_v8  ;;  %v504_v24 = vpop.f32.mrb[11].mxu1 }
  0xfa   : > { %1083 = vst [vmem:[%s1281_s27 + $0x28] sm:$0xff] %v1027_v7   ;;  %v1067_v23 = vpack.c.bf16 %v1321_v18, %v1316_v13  ;;  %v1062_v26 = vpack.c.bf16 %v504_v24, %v1319_v17  ;;  %v749_v4 = vmul.f32 %v1303_v57, %v1303_v57  ;;  %v750_v8 = vmul.f32 %v1309_v0, %v1309_v0 }
  0xfb   : > { %1082 = vst [vmem:[%s1281_s27 + $0x20] sm:$0xff] %v1022_v10   ;;  %v701_v15 = vadd.f32 %v1129_v61, %v700_v11  ;;  %v769_v16 = vadd.f32 %v768_v9, %v738_v12  ;;  %v746_v61 = vmul.f32 %v1293_v40, %v1293_v40 }
  0xfc   : > { %1091 = vst [vmem:[%s1281_s27 + $0x68] sm:$0xff] %v1067_v23   ;;  %1090 = vst [vmem:[%s1281_s27 + $0x60] sm:$0xff] %v1062_v26  }
  0xfd   : > { %v770_v20 = vadd.f32 %v769_v16, %v739_v14  ;;  %v1133_v21 = vpop.f32.mrb[12].mxu0  ;;  %v702_v22 = vadd.f32 %v1130_v6, %v701_v15 }
  0xfe   : > { %v453_v25 = vpop.f32.mrb[13].mxu0  ;;  %v1149_v41 = vpop.f32.mrb[12].mxu1  ;;  %v743_v42 = vmul.f32 %v1133_v21, %v1133_v21 }
  0xff   : > { %v703_v27 = vadd.f32 %v702_v22, %v453_v25  ;;  %v741_v28 = vmul.f32 %v453_v25, %v453_v25  ;;  %v771_v30 = vadd.f32 %v770_v20, %v740_v19  ;;  %v1134_v31 = vpop.f32.mrb[14].mxu0  ;;  %v517_v45 = vpop.f32.mrb[13].mxu1  ;;  %v754_v19 = vmul.f32 %v504_v24, %v504_v24 }
 0x100   : > { %v1037_v32 = vpack.c.bf16 %v1134_v31, %v1133_v21  ;;  %v456_v35 = vpop.f32.mrb[15].mxu0  ;;  %v1150_v47 = vpop.f32.mrb[14].mxu1  ;;  %v744_v48 = vmul.f32 %v1134_v31, %v1134_v31  ;;  %v755_v20 = vmul.f32 %v1316_v13, %v1316_v13  ;;  %v756_v22 = vmul.f32 %v1321_v18, %v1321_v18 }
 0x101   : > { %v772_v36 = vadd.f32 %v771_v30, %v741_v28  ;;  %v1032_v37 = vpack.c.bf16 %v456_v35, %v453_v25  ;;  %v704_v38 = vadd.f32 %v703_v27, %v456_v35  ;;  %v742_v39 = vmul.f32 %v456_v35, %v456_v35  ;;  %v520_v52 = vpop.f32.mrb[15].mxu1 }
 0x102   : > { %1085 = vst [vmem:[%s1281_s27 + $0x38] sm:$0xff] %v1037_v32   ;;  %v1077_v51 = vpack.c.bf16 %v1150_v47, %v1149_v41  ;;  %v1072_v54 = vpack.c.bf16 %v520_v52, %v517_v45  ;;  %v757_v25 = vmul.f32 %v517_v45, %v517_v45  ;;  %v759_v30 = vmul.f32 %v1149_v41, %v1149_v41 }
 0x103   : > { %1084 = vst [vmem:[%s1281_s27 + $0x30] sm:$0xff] %v1032_v37   ;;  %v705_v43 = vadd.f32 %v1133_v21, %v704_v38  ;;  %v773_v44 = vadd.f32 %v772_v36, %v742_v39  ;;  %v760_v35 = vmul.f32 %v1150_v47, %v1150_v47 }
 0x104   : > { %1093 = vst [vmem:[%s1281_s27 + $0x78] sm:$0xff] %v1077_v51   ;;  %1092 = vst [vmem:[%s1281_s27 + $0x70] sm:$0xff] %v1072_v54  }
 0x105   : > { %v774_v49 = vadd.f32 %v773_v44, %v743_v42  ;;  %v706_v50 = vadd.f32 %v1134_v31, %v705_v43 }
 0x107   : > { %v707_v55 = vadd.f32 %v706_v50, %v1287_v33  ;;  %v775_v56 = vadd.f32 %v774_v49, %v744_v48 }
 0x109   : > { %v776_v59 = vadd.f32 %v775_v56, %v745_v46  ;;  %v708_v60 = vadd.f32 %v707_v55, %v1293_v40 }
 0x10b   : > { %v709_v63 = vadd.f32 %v1284_v29, %v708_v60  ;;  %v777_v1 = vadd.f32 %v776_v59, %v746_v61  ;;  %v751_v29 = vmul.f32 %v1300_v53, %v1300_v53 }
 0x10d   : > { %v778_v3 = vadd.f32 %v777_v1, %v747_v62  ;;  %v710_v33 = vadd.f32 %v1289_v34, %v709_v63  ;;  %v752_v34 = vmul.f32 %v1305_v58, %v1305_v58 }
 0x10f   : > { %v711_v5 = vadd.f32 %v710_v33, %v1303_v57  ;;  %v779_v6 = vadd.f32 %v778_v3, %v748_v2  ;;  %v753_v57 = vmul.f32 %v1319_v17, %v1319_v17 }
 0x111   : > { %v780_v7 = vadd.f32 %v779_v6, %v749_v4  ;;  %v712_v40 = vadd.f32 %v711_v5, %v1309_v0 }
 0x113   : > { %v713_v9 = vadd.f32 %v1300_v53, %v712_v40  ;;  %v781_v10 = vadd.f32 %v780_v7, %v750_v8 }
 0x115   : > { %v782_v11 = vadd.f32 %v781_v10, %v751_v29  ;;  %v714_v12 = vadd.f32 %v1305_v58, %v713_v9 }
 0x117   : > { %v715_v14 = vadd.f32 %v714_v12, %v1319_v17  ;;  %v783_v15 = vadd.f32 %v782_v11, %v752_v34 }
 0x119   : > { %v784_v16 = vadd.f32 %v783_v15, %v753_v57  ;;  %v716_v0 = vadd.f32 %v715_v14, %v504_v24  ;;  %v758_v24 = vmul.f32 %v520_v52, %v520_v52 }
 0x11b   : > { %v717_v53 = vadd.f32 %v1316_v13, %v716_v0  ;;  %v785_v21 = vadd.f32 %v784_v16, %v754_v19 }
 0x11d   : > { %v786_v23 = vadd.f32 %v785_v21, %v755_v20  ;;  %v718_v58 = vadd.f32 %v1321_v18, %v717_v53 }
 0x11f   : > { %v719_v26 = vadd.f32 %v718_v58, %v517_v45  ;;  %v787_v17 = vadd.f32 %v786_v23, %v756_v22 }
 0x121   : > { %v788_v27 = vadd.f32 %v787_v17, %v757_v25  ;;  %v720_v28 = vadd.f32 %v719_v26, %v520_v52 }
 0x123   : > { %v721_v31 = vadd.f32 %v1149_v41, %v720_v28  ;;  %v789_v32 = vadd.f32 %v788_v27, %v758_v24 }
 0x125   : > { %v722_v13 = vadd.f32 %v1150_v47, %v721_v31  ;;  %v790_v36 = vadd.f32 %v789_v32, %v759_v30 }
 0x127   : > { %v723_v37 = vrot.slane %v722_v13, 4  ;;  %v791_v38 = vadd.f32 %v790_v36, %v760_v35 }
 0x129   : > { %v724_v39 = vadd.f32 %v723_v37, %v722_v13  ;;  %v792_v42 = vrot.slane %v791_v38, 4 }
 0x12b   : > { %v725_v43 = vrot.slane %v724_v39, 2  ;;  %v793_v18 = vadd.f32 %v792_v42, %v791_v38 }
 0x12d   : > { %v726_v44 = vadd.f32 %v725_v43, %v724_v39  ;;  %v794_v45 = vrot.slane %v793_v18, 2 }
 0x12f   : > { %v727_v46 = vrot.slane %v726_v44, 1  ;;  %v795_v48 = vadd.f32 %v794_v45, %v793_v18 }
 0x131   : > { %v796_v49 = vrot.slane %v795_v48, 1  ;;  %v728_v41 = vadd.f32 %v727_v46, %v726_v44 }
 0x133   : > { %v797_v47 = vadd.f32 %v796_v49, %v795_v48 }
 0x135   : > { %v799_v50 = vsel %vm798_vm2, %v728_v41, %v797_v47 }
 0x136   : > { %800 = vst [vmem:[%s184_s4] sm:$0x3] %v799_v50 }
 0x137 PF: > { %s14_s12 = sadd.s32 1, %s1192_s12  }
 0x138   : > { %p11_p5 = scmp.ge.s32.totalorder %s14_s12, 4  }
 0x13a   :  { %13 = sbr.rel (!%p11_p5) target bundleno = 1 (0x1), region = 70 }

</bundles_post_ra>
